<compile_context>
chip_gen: v7x
topology: tpu7x:2x2x1
jax: 0.10.0
libtpu: 0.0.40
codegen_flags: <defaults>
</compile_context>

<pallas_src>
import jax
import jax.numpy as jnp
from jax.experimental import pallas as pl
from jax.experimental.pallas import tpu as pltpu

INPUT_SIZE = 7
IN_PADDED = 8            # pad input features 7 -> 8 (sublane-clean)
HIDDEN_SIZE = 75
HIDDEN_PADDED = 128      # 75 already occupies 128 lanes in VMEM; make it explicit
OUTPUT_SIZE = 2
DEFAULT_TILE_B = 2048    # batch tile (lane dim); sweepable, VMEM use is tiny


def _net_kernel(x_ref, w1t_ref, b1_ref, w2t_ref, b2_ref, w3d_ref, b3d_ref, o_ref):
    """Feature-major fused MLP.  x_ref: (8, tile_b); o_ref: (2, tile_b)."""
    w_dtype = w1t_ref.dtype                       # bf16 or f32 (matches weights)
    x = x_ref[...].astype(w_dtype)                # (8, tile_b)

    # fc1 + sigmoid.  sigmoid(h) = 0.5*tanh(0.5*h) + 0.5  -> single EUP op.
    h1 = jnp.dot(w1t_ref[...], x, preferred_element_type=jnp.float32) + b1_ref[...]
    h1 = 0.5 * jnp.tanh(0.5 * h1) + 0.5           # (128, tile_b), f32

    # fc2 + sigmoid.  Cast activations to the weight dtype so the MXU runs a
    # true bf16 x bf16 matmul when weights are bf16 (f32 accumulate).
    h2 = jnp.dot(w2t_ref[...], h1.astype(w_dtype),
                 preferred_element_type=jnp.float32) + b2_ref[...]
    h2 = 0.5 * jnp.tanh(0.5 * h2) + 0.5           # (128, tile_b), f32

    # Specialized 2-class head: d = logit1 - logit0.
    d = jnp.dot(w3d_ref[...], h2.astype(w_dtype),
                preferred_element_type=jnp.float32) + b3d_ref[...]   # (1, tile_b)

    # log_softmax over {class0, class1}:
    #   logp0 = -softplus(d),  logp1 = d - softplus(d)
    # softplus(d) = max(d, 0) + log(1 + exp(-|d|))   (stable; exp arg <= 0)
    sp = jnp.maximum(d, 0.0) + jnp.log(1.0 + jnp.exp(-jnp.abs(d)))
    o_ref[...] = jnp.concatenate([-sp, d - sp], axis=0).astype(o_ref.dtype)


def _round_up(v, m):
    return (v + m - 1) // m * m


def _choose_tile_b(batch, tile_b):
    """Batch tile: multiple of 128 (lane dim), >=2 tiles when B>128 (v7x TCs)."""
    if batch <= 128:
        return batch                      # single tile == full batch (allowed)
    t = min(_round_up(tile_b, 128), _round_up(batch, 128))
    if pl.cdiv(batch, t) < 2:             # keep both v7x TensorCores busy
        t = max(128, _round_up(pl.cdiv(batch, 2), 128))
    return t


def init_params(key):
    """torch.nn.Linear-style init (U[-1/sqrt(fan_in), +]); weights stored [in, out]."""
    def linear(key, fan_in, fan_out):
        kw, kb = jax.random.split(key)
        bound = 1.0 / jnp.sqrt(fan_in)
        w = jax.random.uniform(kw, (fan_in, fan_out), jnp.float32, -bound, bound)
        b = jax.random.uniform(kb, (1, fan_out), jnp.float32, -bound, bound)
        return w, b

    k1, k2, k3 = jax.random.split(key, 3)
    w1, b1 = linear(k1, INPUT_SIZE, HIDDEN_SIZE)
    w2, b2 = linear(k2, HIDDEN_SIZE, HIDDEN_SIZE)
    w3, b3 = linear(k3, HIDDEN_SIZE, OUTPUT_SIZE)
    return (w1, b1, w2, b2, w3, b3)


def pad_params(params, dtype=jnp.float32):
    """Feature-major (transposed) weights, zero-padded 75->128 / 7->8.

    Weight matrices are cast to `dtype` (bf16 for the fast MXU path); biases
    stay f32 (added to the f32 accumulator).  The padding is exact: padded
    hidden units produce sigmoid(0)=0.5 but the corresponding columns of the
    next layer's (transposed) weights are zero, so they never reach the output.
    The 2-class head is pre-reduced to a single logit difference.
    """
    w1, b1, w2, b2, w3, b3 = params
    hp, ip = HIDDEN_PADDED, IN_PADDED
    w1t = jnp.zeros((hp, ip), jnp.float32).at[:HIDDEN_SIZE, :INPUT_SIZE].set(w1.T)
    b1c = jnp.zeros((hp, 1), jnp.float32).at[:HIDDEN_SIZE, 0].set(b1.reshape(-1))
    w2t = jnp.zeros((hp, hp), jnp.float32).at[:HIDDEN_SIZE, :HIDDEN_SIZE].set(w2.T)
    b2c = jnp.zeros((hp, 1), jnp.float32).at[:HIDDEN_SIZE, 0].set(b2.reshape(-1))
    w3d = jnp.zeros((1, hp), jnp.float32).at[0, :HIDDEN_SIZE].set(w3[:, 1] - w3[:, 0])
    b3f = b3.reshape(-1).astype(jnp.float32)
    b3d = jnp.full((1, 1), b3f[1] - b3f[0], jnp.float32)
    return (w1t.astype(dtype), b1c, w2t.astype(dtype), b2c, w3d.astype(dtype), b3d)


def net_forward(x, fm_params, *, tile_b=DEFAULT_TILE_B):
    """x: [B, 7] (f32 or bf16); fm_params from pad_params(). Returns [B, 2] f32 log-probs."""
    w1t, b1c, w2t, b2c, w3d, b3d = fm_params
    batch = x.shape[0]

    # Feature-major, lane-dense input slab: (8, B), zero-padded feature row.
    xt = jnp.zeros((IN_PADDED, batch), x.dtype).at[:INPUT_SIZE, :].set(x.T)

    tile_b = _choose_tile_b(batch, tile_b)
    grid = (pl.cdiv(batch, tile_b),)

    def resident(a):  # full-array, VMEM-resident across all grid steps
        return pl.BlockSpec(a.shape, lambda i: (0, 0))

    in_specs = [
        pl.BlockSpec((IN_PADDED, tile_b), lambda i: (0, i)),   # x: tiled over batch lanes
        resident(w1t), resident(b1c),
        resident(w2t), resident(b2c),
        resident(w3d), resident(b3d),
    ]
    out_specs = pl.BlockSpec((OUTPUT_SIZE, tile_b), lambda i: (0, i))

    def nbytes(a):
        return int(a.size) * jnp.dtype(a.dtype).itemsize

    hp = HIDDEN_PADDED
    cost = pl.CostEstimate(
        flops=2 * batch * (IN_PADDED * hp + hp * hp + hp * 1),
        transcendentals=batch * (2 * hp + 2),
        bytes_accessed=nbytes(xt) + batch * OUTPUT_SIZE * 4
        + sum(nbytes(p) for p in fm_params),
    )

    out_fm = pl.pallas_call(
        _net_kernel,
        out_shape=jax.ShapeDtypeStruct((OUTPUT_SIZE, batch), jnp.float32),
        grid=grid,
        in_specs=in_specs,
        out_specs=out_specs,
        compiler_params=pltpu.CompilerParams(
            dimension_semantics=("parallel",),       # v7x: 2 TensorCores split the batch
            vmem_limit_bytes=32 * 1024 * 1024,       # ample; tiles are a few MiB at most
        ),
        cost_estimate=cost,
    )(xt, w1t, b1c, w2t, b2c, w3d, b3d)

    return out_fm.T                                  # (B, 2) log-probs


def _reference_torch(x, raw_params):
    """Pure-JAX mirror of the PyTorch module (f32, unpadded)."""
    w1, b1, w2, b2, w3, b3 = raw_params
    h1 = jax.nn.sigmoid(x.astype(jnp.float32) @ w1 + b1)
    h2 = jax.nn.sigmoid(h1 @ w2 + b2)
    logits = h2 @ w3 + b3
    return jax.nn.log_softmax(logits, axis=-1)


def _reference_padded(x, fm_params):
    """Pure-JAX reference mirroring the kernel's padded / low-precision math."""
    w1t, b1c, w2t, b2c, w3d, b3d = fm_params
    wdt = w1t.dtype
    batch = x.shape[0]
    xt = jnp.zeros((IN_PADDED, batch), x.dtype).at[:INPUT_SIZE, :].set(x.T)
    h1 = jax.nn.sigmoid(
        jnp.dot(w1t, xt.astype(wdt), preferred_element_type=jnp.float32) + b1c)
    h2 = jax.nn.sigmoid(
        jnp.dot(w2t, h1.astype(wdt), preferred_element_type=jnp.float32) + b2c)
    d = (jnp.dot(w3d, h2.astype(wdt), preferred_element_type=jnp.float32) + b3d)[0]
    sp = jax.nn.softplus(d)
    return jnp.stack([-sp, d - sp], axis=-1)


if __name__ == "__main__":
    key = jax.random.PRNGKey(0)
    k_params, k_x1, k_x2 = jax.random.split(key, 3)
    raw_params = init_params(k_params)

    # --- f32 path, tiny batch (single tile); check against the PyTorch-equivalent math ---
    params_f32 = pad_params(raw_params, jnp.float32)
    x_small = jax.random.normal(k_x1, (8, INPUT_SIZE), dtype=jnp.float32)
    out_small = jax.block_until_ready(net_forward(x_small, params_f32))
    ref_small = _reference_torch(x_small, raw_params)
    assert out_small.shape == (8, OUTPUT_SIZE)
    assert jnp.allclose(out_small, ref_small, atol=2e-3, rtol=2e-3), "f32 mismatch vs torch reference"

    # --- bf16-weight path, multi-tile grid with a partial last block ---
    params_bf16 = pad_params(raw_params, jnp.bfloat16)
    x_big = jax.random.normal(k_x2, (1000, INPUT_SIZE), dtype=jnp.float32).astype(jnp.bfloat16)
    out_big = jax.block_until_ready(net_forward(x_big, params_bf16, tile_b=256))
    ref_big = _reference_padded(x_big, params_bf16)
    assert out_big.shape == (1000, OUTPUT_SIZE)
    assert jnp.allclose(out_big, ref_big, atol=2e-3, rtol=2e-3), "bf16 mismatch vs padded reference"

    # --- default-tile path on the same batch (2 x 512 tiles -> both v7x TCs) ---
    out_big2 = jax.block_until_ready(net_forward(x_big, params_bf16))
    assert jnp.allclose(out_big2, ref_big, atol=2e-3, rtol=2e-3), "default-tile mismatch"

    print("KERNEL_OK")
</pallas_src>

<mosaic_0001>
module attributes {stable_mosaic.version = 11 : i64} {
  func.func @_net_kernel(%arg0: i32, %arg1: memref<8x8xf32, #tpu.memory_space<vmem>>, %arg2: memref<128x8xf32, #tpu.memory_space<vmem>>, %arg3: memref<128x1xf32, #tpu.memory_space<vmem>>, %arg4: memref<128x128xf32, #tpu.memory_space<vmem>>, %arg5: memref<128x1xf32, #tpu.memory_space<vmem>>, %arg6: memref<1x128xf32, #tpu.memory_space<vmem>>, %arg7: memref<1x1xf32, #tpu.memory_space<vmem>>, %arg8: memref<2x8xf32, #tpu.memory_space<vmem>>) attributes {dimension_semantics = [#tpu.dimension_semantics<parallel>], iteration_bounds = array<i64: 1>, scalar_prefetch = 0 : i64, scratch_operands = 0 : i64, tpu.core_type = #tpu.core_type<tc>, window_params = [{transform_indices = @transform_0, window_bounds = array<i64: 8, 8>}, {pipeline_mode = #tpu.pipeline_mode<synchronous>, transform_indices = @transform_1, window_bounds = array<i64: 128, 8>}, {pipeline_mode = #tpu.pipeline_mode<synchronous>, transform_indices = @transform_2, window_bounds = array<i64: 128, 1>}, {pipeline_mode = #tpu.pipeline_mode<synchronous>, transform_indices = @transform_3, window_bounds = array<i64: 128, 128>}, {pipeline_mode = #tpu.pipeline_mode<synchronous>, transform_indices = @transform_4, window_bounds = array<i64: 128, 1>}, {pipeline_mode = #tpu.pipeline_mode<synchronous>, transform_indices = @transform_5, window_bounds = array<i64: 1, 128>}, {pipeline_mode = #tpu.pipeline_mode<synchronous>, transform_indices = @transform_6, window_bounds = array<i64: 1, 1>}, {transform_indices = @transform_7, window_bounds = array<i64: 2, 8>}]} {
    %c0 = arith.constant 0 : index
    %c0_0 = arith.constant 0 : index
    %0 = vector.load %arg1[%c0, %c0_0] : memref<8x8xf32, #tpu.memory_space<vmem>>, vector<8x8xf32>
    %c0_1 = arith.constant 0 : index
    %c0_2 = arith.constant 0 : index
    %1 = vector.load %arg2[%c0_1, %c0_2] : memref<128x8xf32, #tpu.memory_space<vmem>>, vector<128x8xf32>
    %cst = arith.constant dense<0.000000e+00> : vector<128x8xf32>
    %2 = tpu.matmul %1, %0, %cst {dimension_numbers = #tpu.dot_dimension_numbers<[1], [0], [0], [1], [0, 0, 1, 1], [], []>} : vector<128x8xf32>, vector<8x8xf32>, vector<128x8xf32> -> vector<128x8xf32>
    %c0_3 = arith.constant 0 : index
    %c0_4 = arith.constant 0 : index
    %3 = vector.load %arg3[%c0_3, %c0_4] : memref<128x1xf32, #tpu.memory_space<vmem>>, vector<128x1xf32>
    %4 = vector.broadcast %3 : vector<128x1xf32> to vector<128x8xf32>
    %5 = arith.addf %2, %4 : vector<128x8xf32>
    %cst_5 = arith.constant 5.000000e-01 : f32
    %6 = vector.broadcast %cst_5 : f32 to vector<128x8xf32>
    %7 = arith.mulf %6, %5 : vector<128x8xf32>
    %8 = math.tanh %7 : vector<128x8xf32>
    %cst_6 = arith.constant 5.000000e-01 : f32
    %9 = vector.broadcast %cst_6 : f32 to vector<128x8xf32>
    %10 = arith.mulf %9, %8 : vector<128x8xf32>
    %cst_7 = arith.constant 5.000000e-01 : f32
    %11 = vector.broadcast %cst_7 : f32 to vector<128x8xf32>
    %12 = arith.addf %10, %11 : vector<128x8xf32>
    %c0_8 = arith.constant 0 : index
    %c0_9 = arith.constant 0 : index
    %13 = vector.load %arg4[%c0_8, %c0_9] : memref<128x128xf32, #tpu.memory_space<vmem>>, vector<128x128xf32>
    %cst_10 = arith.constant dense<0.000000e+00> : vector<128x8xf32>
    %14 = tpu.matmul %13, %12, %cst_10 {dimension_numbers = #tpu.dot_dimension_numbers<[1], [0], [0], [1], [0, 0, 1, 1], [], []>} : vector<128x128xf32>, vector<128x8xf32>, vector<128x8xf32> -> vector<128x8xf32>
    %c0_11 = arith.constant 0 : index
    %c0_12 = arith.constant 0 : index
    %15 = vector.load %arg5[%c0_11, %c0_12] : memref<128x1xf32, #tpu.memory_space<vmem>>, vector<128x1xf32>
    %16 = vector.broadcast %15 : vector<128x1xf32> to vector<128x8xf32>
    %17 = arith.addf %14, %16 : vector<128x8xf32>
    %cst_13 = arith.constant 5.000000e-01 : f32
    %18 = vector.broadcast %cst_13 : f32 to vector<128x8xf32>
    %19 = arith.mulf %18, %17 : vector<128x8xf32>
    %20 = math.tanh %19 : vector<128x8xf32>
    %cst_14 = arith.constant 5.000000e-01 : f32
    %21 = vector.broadcast %cst_14 : f32 to vector<128x8xf32>
    %22 = arith.mulf %21, %20 : vector<128x8xf32>
    %cst_15 = arith.constant 5.000000e-01 : f32
    %23 = vector.broadcast %cst_15 : f32 to vector<128x8xf32>
    %24 = arith.addf %22, %23 : vector<128x8xf32>
    %c0_16 = arith.constant 0 : index
    %c0_17 = arith.constant 0 : index
    %25 = vector.load %arg6[%c0_16, %c0_17] : memref<1x128xf32, #tpu.memory_space<vmem>>, vector<1x128xf32>
    %cst_18 = arith.constant dense<0.000000e+00> : vector<1x8xf32>
    %26 = tpu.matmul %25, %24, %cst_18 {dimension_numbers = #tpu.dot_dimension_numbers<[1], [0], [0], [1], [0, 0, 1, 1], [], []>} : vector<1x128xf32>, vector<128x8xf32>, vector<1x8xf32> -> vector<1x8xf32>
    %c0_19 = arith.constant 0 : index
    %c0_20 = arith.constant 0 : index
    %27 = vector.load %arg7[%c0_19, %c0_20] : memref<1x1xf32, #tpu.memory_space<vmem>>, vector<1x1xf32>
    %28 = vector.broadcast %27 : vector<1x1xf32> to vector<1x8xf32>
    %29 = arith.addf %26, %28 : vector<1x8xf32>
    %cst_21 = arith.constant 0.000000e+00 : f32
    %30 = vector.broadcast %cst_21 : f32 to vector<1x8xf32>
    %31 = arith.maximumf %29, %30 : vector<1x8xf32>
    %32 = math.absf %29 : vector<1x8xf32>
    %cst_22 = arith.constant 0.000000e+00 : f32
    %33 = vector.broadcast %cst_22 : f32 to vector<1x8xf32>
    %34 = arith.subf %33, %32 : vector<1x8xf32>
    %35 = math.exp %34 : vector<1x8xf32>
    %cst_23 = arith.constant 1.000000e+00 : f32
    %36 = vector.broadcast %cst_23 : f32 to vector<1x8xf32>
    %37 = arith.addf %36, %35 : vector<1x8xf32>
    %38 = math.log %37 : vector<1x8xf32>
    %39 = arith.addf %31, %38 : vector<1x8xf32>
    %cst_24 = arith.constant 0.000000e+00 : f32
    %40 = vector.broadcast %cst_24 : f32 to vector<1x8xf32>
    %41 = arith.subf %40, %39 : vector<1x8xf32>
    %42 = arith.subf %29, %39 : vector<1x8xf32>
    %43 = tpu.concatenate %41, %42 in 0 : vector<1x8xf32>, vector<1x8xf32> -> vector<2x8xf32>
    %c0_25 = arith.constant 0 : index
    %c0_26 = arith.constant 0 : index
    %44 = vector.load %arg8[%c0_25, %c0_26] : memref<2x8xf32, #tpu.memory_space<vmem>>, vector<2x8xf32>
    tpu.vector_store %arg8[%c0_25, %c0_26], %43 {strides = array<i32>} : memref<2x8xf32, #tpu.memory_space<vmem>>, vector<2x8xf32>,
    return
  }
  func.func @transform_0(%arg0: i32) -> (i32, i32) {
    %c0_i32 = arith.constant 0 : i32
    %c0_i32_0 = arith.constant 0 : i32
    return %c0_i32, %arg0 : i32, i32
  }
  func.func @transform_1(%arg0: i32) -> (i32, i32) {
    %c0_i32 = arith.constant 0 : i32
    %c0_i32_0 = arith.constant 0 : i32
    %c0_i32_1 = arith.constant 0 : i32
    return %c0_i32, %c0_i32_0 : i32, i32
  }
  func.func @transform_2(%arg0: i32) -> (i32, i32) {
    %c0_i32 = arith.constant 0 : i32
    %c0_i32_0 = arith.constant 0 : i32
    %c0_i32_1 = arith.constant 0 : i32
    return %c0_i32, %c0_i32_0 : i32, i32
  }
  func.func @transform_3(%arg0: i32) -> (i32, i32) {
    %c0_i32 = arith.constant 0 : i32
    %c0_i32_0 = arith.constant 0 : i32
    %c0_i32_1 = arith.constant 0 : i32
    return %c0_i32, %c0_i32_0 : i32, i32
  }
  func.func @transform_4(%arg0: i32) -> (i32, i32) {
    %c0_i32 = arith.constant 0 : i32
    %c0_i32_0 = arith.constant 0 : i32
    %c0_i32_1 = arith.constant 0 : i32
    return %c0_i32, %c0_i32_0 : i32, i32
  }
  func.func @transform_5(%arg0: i32) -> (i32, i32) {
    %c0_i32 = arith.constant 0 : i32
    %c0_i32_0 = arith.constant 0 : i32
    %c0_i32_1 = arith.constant 0 : i32
    return %c0_i32, %c0_i32_0 : i32, i32
  }
  func.func @transform_6(%arg0: i32) -> (i32, i32) {
    %c0_i32 = arith.constant 0 : i32
    %c0_i32_0 = arith.constant 0 : i32
    %c0_i32_1 = arith.constant 0 : i32
    return %c0_i32, %c0_i32_0 : i32, i32
  }
  func.func @transform_7(%arg0: i32) -> (i32, i32) {
    %c0_i32 = arith.constant 0 : i32
    %c0_i32_0 = arith.constant 0 : i32
    return %c0_i32, %arg0 : i32, i32
  }
}

</mosaic_0001>

<bundles_post_ra>
// kernel: tpu_custom_call.1
= control target key start
LH: loop header
LB: loop body
LE: loop exit
PB: predicated region body
PF: predicated region fallthrough
CT: control target
= control target key end

     0   :  { %s1470_s0 = inlined_call_operand.vmem [shape: f32[8,8], index: 0, kind: input, shape index: {}]   ;;  %s1471_s1 = inlined_call_operand.vmem [shape: f32[128,8], index: 1, kind: input, shape index: {}]   ;;  %s1472_s2 = inlined_call_operand.vmem [shape: f32[128,1], index: 2, kind: input, shape index: {}]   ;;  %s1473_s3 = inlined_call_operand.vmem [shape: f32[128,128], index: 3, kind: input, shape index: {}]   ;;  %s1474_s4 = inlined_call_operand.vmem [shape: f32[128,1], index: 4, kind: input, shape index: {}]   ;;  %s1475_s5 = inlined_call_operand.vmem [shape: f32[1,128], index: 5, kind: input, shape index: {}]   ;;  %s1476_s6 = inlined_call_operand.<no memory space> [shape: f32[1,1], index: 6, kind: input, shape index: {}]   ;;  %s1477_s7 = inlined_call_operand.hbm [shape: f32[2,8], index: 7, kind: output, shape index: {}]  }
   0x1   :  { %v12_v0 = vstv %s1476_s6 }
   0x2   :  { %13 = vst [vmem:[#allocation2] sm:$0x1] %v12_v0 }
   0x3   :  { %v29_v1 = vld [vmem:[%s1470_s0] sm:$0xff]  ;;  %vm142_vm0 = vcmask 64512   ;;  %v31_v3 = vld [vmem:[%s1471_s1 + $0x8] sm:$0xff]  ;;  %v32_v4 = vld [vmem:[%s1471_s1 + $0x10] sm:$0xff]  ;;  %v1188_v5 = vmov 0  }
   0x4   :  { %v30_v2 = vld [vmem:[%s1471_s1] sm:$0xff]  ;;  %916 = vmatprep.subr.mxu0 %v29_v1  ;;  %1094 = vset.pattern.permute.xlu0 %v1188_v5  ;;  %v33_v7 = vld [vmem:[%s1471_s1 + $0x18] sm:$0xff]  ;;  %v47_v9 = vld [vmem:[%s1472_s2 + $0x8] sm:$0xff] }
   0x5   :  { %918 = vmatprep.mubr.msk.f32.mxu0 %vm142_vm0, %v30_v2  ;;  %917 = vmatpush3.msra.mxu0 %v29_v1  ;;  %v46_v6 = vld [vmem:[%s1472_s2] sm:$0xff]  ;;  %v48_v10 = vld [vmem:[%s1472_s2 + $0x10] sm:$0xff]  ;;  %v49_v11 = vld [vmem:[%s1472_s2 + $0x18] sm:$0xff] }
   0x6   :  { %919 = vmatmul.mubr.msk.f32.vlgmr.msra.gmra.mrb[0].mxu0 %vm142_vm0, %v31_v3  ;;  %1095 = vset.pattern.permute.xlu1 %v1188_v5  ;;  %v34_v8 = vld [vmem:[%s1471_s1 + $0x20] sm:$0xff]  ;;  %v35_v12 = vld [vmem:[%s1471_s1 + $0x28] sm:$0xff]  ;;  %v36_v13 = vld [vmem:[%s1471_s1 + $0x30] sm:$0xff] }
   0x7   :  { %921 = vmatprep.mubr.msk.f32.mxu0 %vm142_vm0, %v32_v4  ;;  %64 = vperm.xlu0 %1094, %v46_v6   ;;  %v50_v14 = vld [vmem:[%s1472_s2 + $0x20] sm:$0xff]  ;;  %v51_v15 = vld [vmem:[%s1472_s2 + $0x28] sm:$0xff]  ;;  %v37_v16 = vld [vmem:[%s1471_s1 + $0x38] sm:$0xff] }
   0x8   :  { %74 = vperm.xlu1 %1095, %v48_v10   ;;  %v38_v17 = vld [vmem:[%s1471_s1 + $0x40] sm:$0xff]  ;;  %v52_v18 = vld [vmem:[%s1472_s2 + $0x30] sm:$0xff]  ;;  %v53_v19 = vld [vmem:[%s1472_s2 + $0x38] sm:$0xff] }
   0x9   :  { %v39_v20 = vld [vmem:[%s1471_s1 + $0x48] sm:$0xff] }
   0xa   :  { %922 = vmatmul.mubr.msk.f32.gmra.mrb[2].mxu0 %vm142_vm0, %v33_v7 }
   0xb   :  { %924 = vmatprep.mubr.msk.f32.mxu0 %vm142_vm0, %v34_v8  ;;  %69 = vperm.xlu0 %1094, %v47_v9  }
   0xc   :  { %79 = vperm.xlu1 %1095, %v49_v11  }
   0xe   :  { %925 = vmatmul.mubr.msk.f32.gmra.mrb[4].mxu0 %vm142_vm0, %v35_v12 }
   0xf   :  { %927 = vmatprep.mubr.msk.f32.mxu0 %vm142_vm0, %v36_v13  ;;  %84 = vperm.xlu0 %1094, %v50_v14  }
  0x10   :  { %89 = vperm.xlu1 %1095, %v51_v15  }
  0x12   :  { %928 = vmatmul.mubr.msk.f32.gmra.mrb[6].mxu0 %vm142_vm0, %v37_v16 }
  0x13   :  { %930 = vmatprep.mubr.msk.f32.mxu0 %vm142_vm0, %v38_v17  ;;  %94 = vperm.xlu0 %1094, %v52_v18  }
  0x14   :  { %14 = vsyncpa [#allocation4], 0  ;;  %v40_v21 = vld [vmem:[%s1471_s1 + $0x50] sm:$0xff]  ;;  %v54_v22 = vld [vmem:[%s1472_s2 + $0x40] sm:$0xff]  ;;  %99 = vperm.xlu1 %1095, %v53_v19   ;;  %vm1190_vm1 = vmmov 0   ;;  %vm816_vm2 = vcmask 1040384  }
  0x15   :  { %v55_v23 = vld [vmem:[%s1472_s2 + $0x48] sm:$0xff]  ;;  %v41_v24 = vld [vmem:[%s1471_s1 + $0x58] sm:$0xff]  ;;  %v42_v25 = vld [vmem:[%s1471_s1 + $0x60] sm:$0xff]  ;;  %vm818_vm3 = vcmask 58368  }
  0x16   :  { %931 = vmatmul.mubr.msk.f32.gmra.mrb[8].mxu0 %vm142_vm0, %v39_v20  ;;  %v56_v26 = vld [vmem:[%s1472_s2 + $0x50] sm:$0xff]  ;;  %v57_v27 = vld [vmem:[%s1472_s2 + $0x58] sm:$0xff]  ;;  %v43_v28 = vld [vmem:[%s1471_s1 + $0x68] sm:$0xff] }
  0x17   :  { %933 = vmatprep.mubr.msk.f32.mxu0 %vm142_vm0, %v40_v21  ;;  %104 = vperm.xlu0 %1094, %v54_v22   ;;  %v44_v29 = vld [vmem:[%s1471_s1 + $0x70] sm:$0xff]  ;;  %v58_v30 = vld [vmem:[%s1472_s2 + $0x60] sm:$0xff]  ;;  %v59_v31 = vld [vmem:[%s1472_s2 + $0x68] sm:$0xff] }
  0x18   :  { %109 = vperm.xlu1 %1095, %v55_v23   ;;  %v45_v32 = vld [vmem:[%s1471_s1 + $0x78] sm:$0xff]  ;;  %v60_v33 = vld [vmem:[%s1472_s2 + $0x70] sm:$0xff]  ;;  %v416_v35 = vld [vmem:[%s1474_s4] sm:$0xff] }
  0x19   :  { %v61_v34 = vld [vmem:[%s1472_s2 + $0x78] sm:$0xff]  ;;  %v417_v36 = vld [vmem:[%s1474_s4 + $0x8] sm:$0xff]  ;;  %v418_v37 = vld [vmem:[%s1474_s4 + $0x10] sm:$0xff] }
  0x1a   :  { %934 = vmatmul.mubr.msk.f32.gmra.mrb[10].mxu0 %vm142_vm0, %v41_v24  ;;  %v419_v38 = vld [vmem:[%s1474_s4 + $0x18] sm:$0xff]  ;;  %v420_v39 = vld [vmem:[%s1474_s4 + $0x20] sm:$0xff]  ;;  %v421_v40 = vld [vmem:[%s1474_s4 + $0x28] sm:$0xff] }
  0x1b   :  { %936 = vmatprep.mubr.msk.f32.mxu0 %vm142_vm0, %v42_v25  ;;  %114 = vperm.xlu0 %1094, %v56_v26   ;;  %v422_v41 = vld [vmem:[%s1474_s4 + $0x30] sm:$0xff]  ;;  %v423_v42 = vld [vmem:[%s1474_s4 + $0x38] sm:$0xff]  ;;  %v424_v43 = vld [vmem:[%s1474_s4 + $0x40] sm:$0xff] }
  0x1c   :  { %119 = vperm.xlu1 %1095, %v57_v27   ;;  %v425_v44 = vld [vmem:[%s1474_s4 + $0x48] sm:$0xff]  ;;  %v426_v45 = vld [vmem:[%s1474_s4 + $0x50] sm:$0xff]  ;;  %v427_v46 = vld [vmem:[%s1474_s4 + $0x58] sm:$0xff] }
  0x1d   :  { %v428_v47 = vld [vmem:[%s1474_s4 + $0x60] sm:$0xff]  ;;  %v429_v48 = vld [vmem:[%s1474_s4 + $0x68] sm:$0xff]  ;;  %v430_v49 = vld [vmem:[%s1474_s4 + $0x70] sm:$0xff] }
  0x1e   :  { %937 = vmatmul.mubr.msk.f32.gmra.mrb[12].mxu0 %vm142_vm0, %v43_v28  ;;  %v431_v50 = vld [vmem:[%s1474_s4 + $0x78] sm:$0xff]  ;;  %v722_v51 = vld [vmem:[#allocation2] sm:$0x1] }
  0x1f   :  { %939 = vmatprep.mubr.msk.f32.mxu0 %vm142_vm0, %v44_v29  ;;  %124 = vperm.xlu0 %1094, %v58_v30   ;;  %v400_v52 = vld [vmem:[%s1473_s3] sm:$0xff] }
  0x20   :  { %129 = vperm.xlu1 %1095, %v59_v31   ;;  %974 = vmatprep.mubr.f32.mxu1 %v400_v52 }
  0x22   :  { %940 = vmatmul.mubr.msk.f32.gmra.mrb[14].mxu0 %vm142_vm0, %v45_v32 }
  0x23   :  { %134 = vperm.xlu0 %1094, %v60_v33  }
  0x24   :  { %139 = vperm.xlu1 %1095, %v61_v34  }
  0x27   :  { %434 = vperm.xlu0 %1094, %v416_v35  }
  0x28   :  { %439 = vperm.xlu1 %1095, %v417_v36  }
  0x2b   :  { %444 = vperm.xlu0 %1094, %v418_v37  }
  0x2c   :  { %449 = vperm.xlu1 %1095, %v419_v38  }
  0x2f   :  { %454 = vperm.xlu0 %1094, %v420_v39  }
  0x30   :  { %459 = vperm.xlu1 %1095, %v421_v40  }
  0x33   :  { %464 = vperm.xlu0 %1094, %v422_v41  }
  0x34   :  { %469 = vperm.xlu1 %1095, %v423_v42  }
  0x37   :  { %474 = vperm.xlu0 %1094, %v424_v43  }
  0x38   :  { %479 = vperm.xlu1 %1095, %v425_v44  }
  0x3b   :  { %484 = vperm.xlu0 %1094, %v426_v45  }
  0x3c   :  { %489 = vperm.xlu1 %1095, %v427_v46  }
  0x3f   :  { %494 = vperm.xlu0 %1094, %v428_v47  }
  0x40   :  { %499 = vperm.xlu1 %1095, %v429_v48  }
  0x43   :  { %504 = vperm.xlu0 %1094, %v430_v49  }
  0x44   :  { %509 = vperm.xlu1 %1095, %v431_v50  }
  0x47   :  { %725 = vperm.xlu0 %1094, %v722_v51  }
  0x86   :  { %v65_v54 = vpop.permute.xlu0 %64 }
  0x87   :  { %v75_v53 = vpop.permute.xlu1 %74 }
  0x8a   :  { %v70_v56 = vpop.permute.xlu0 %69 }
  0x8b   :  { %v80_v55 = vpop.permute.xlu1 %79 }
  0x8e   :  { %v85_v58 = vpop.permute.xlu0 %84 }
  0x8f   :  { %v90_v57 = vpop.permute.xlu1 %89 }
  0x92   :  { %v95_v3 = vpop.permute.xlu0 %94 }
  0x93   :  { %v100_v0 = vpop.permute.xlu1 %99 }
  0x96   :  { %v105_v14 = vpop.permute.xlu0 %104 }
  0x97   :  { %v110_v12 = vpop.permute.xlu1 %109 }
  0x9a   :  { %v115_v28 = vpop.permute.xlu0 %114 }
  0x9b   :  { %v120_v24 = vpop.permute.xlu1 %119 }
  0x9e   :  { %v125_v49 = vpop.permute.xlu0 %124 }
  0x9f   :  { %v130_v45 = vpop.permute.xlu1 %129 }
  0xd9   :  { %v920_v59 = vpop.f32.mrb[0].mxu0 }
  0xda   :  { %v263_v60 = vadd.f32 %v920_v59, %v70_v56  ;;  %v257_v61 = vpop.f32.mrb[1].mxu0 }
  0xdb   :  { %v258_v62 = vadd.f32 %v257_v61, %v65_v54 }
  0xdc   :  { %v337_v63 = vmul.f32 0.5, %v263_v60 }
  0xdd   :  { %v336_v1 = vmul.f32 0.5, %v258_v62  ;;  %v923_v2 = vpop.f32.mrb[2].mxu0 }
  0xde   :  { %1096 = vtanh.f32 %v337_v63  ;;  %v273_v4 = vadd.f32 %v923_v2, %v80_v55  ;;  %v267_v5 = vpop.f32.mrb[3].mxu0  ;;  %v140_v2 = vpop.permute.xlu1 %139 }
  0xdf   :  { %1098 = vtanh.f32 %v336_v1  ;;  %v268_v6 = vadd.f32 %v267_v5, %v75_v53 }
  0xe0   :  { %v339_v7 = vmul.f32 0.5, %v273_v4 }
  0xe1   :  { %v338_v8 = vmul.f32 0.5, %v268_v6  ;;  %v926_v9 = vpop.f32.mrb[4].mxu0  ;;  %v135_v6 = vpop.permute.xlu0 %134 }
  0xe2   :  { %1100 = vtanh.f32 %v339_v7  ;;  %v283_v10 = vadd.f32 %v926_v9, %v90_v57  ;;  %v277_v11 = vpop.f32.mrb[5].mxu0 }
  0xe3   :  { %1102 = vtanh.f32 %v338_v8  ;;  %v278_v13 = vadd.f32 %v277_v11, %v85_v58 }
  0xe4   :  { %v341_v15 = vmul.f32 0.5, %v283_v10 }
  0xe5   :  { %v340_v16 = vmul.f32 0.5, %v278_v13  ;;  %v929_v17 = vpop.f32.mrb[6].mxu0 }
  0xe6   :  { %1104 = vtanh.f32 %v341_v15  ;;  %v293_v18 = vadd.f32 %v929_v17, %v100_v0  ;;  %v287_v19 = vpop.f32.mrb[7].mxu0 }
  0xe7   :  { %1106 = vtanh.f32 %v340_v16  ;;  %v288_v20 = vadd.f32 %v287_v19, %v95_v3 }
  0xe8   :  { %v1097_v21 = vpop.eup %1096  ;;  %v343_v22 = vmul.f32 0.5, %v293_v18 }
  0xe9   :  { %v1099_v23 = vpop.eup %1098  ;;  %v342_v25 = vmul.f32 0.5, %v288_v20  ;;  %v932_v26 = vpop.f32.mrb[8].mxu0  ;;  %v369_v27 = vmul.f32 0.5, %v1097_v21 }
  0xea   :  { %1108 = vtanh.f32 %v343_v22  ;;  %v303_v29 = vadd.f32 %v932_v26, %v110_v12  ;;  %v297_v30 = vpop.f32.mrb[9].mxu0  ;;  %v368_v31 = vmul.f32 0.5, %v1099_v23 }
  0xeb   :  { %1110 = vtanh.f32 %v342_v25  ;;  %v298_v32 = vadd.f32 %v297_v30, %v105_v14  ;;  %v385_v33 = vadd.f32 0.5, %v369_v27 }
  0xec   :  { %v1101_v34 = vpop.eup %1100  ;;  %v345_v35 = vmul.f32 0.5, %v303_v29  ;;  %v384_v36 = vadd.f32 0.5, %v368_v31 }
  0xed   :  { %v1103_v37 = vpop.eup %1102  ;;  %v371_v38 = vmul.f32 0.5, %v1101_v34  ;;  %v344_v39 = vmul.f32 0.5, %v298_v32  ;;  %v935_v40 = vpop.f32.mrb[10].mxu0 }
  0xee   :  { %v370_v41 = vmul.f32 0.5, %v1103_v37  ;;  %1112 = vtanh.f32 %v345_v35  ;;  %v313_v42 = vadd.f32 %v935_v40, %v120_v24  ;;  %v307_v43 = vpop.f32.mrb[11].mxu0  ;;  %v1033_v44 = vpack.c.bf16 %v385_v33, %v384_v36 }
  0xef   :  { %v387_v46 = vadd.f32 0.5, %v371_v38  ;;  %1114 = vtanh.f32 %v344_v39  ;;  %v308_v47 = vadd.f32 %v307_v43, %v115_v28 }
  0xf0   :  { %v1105_v48 = vpop.eup %1104  ;;  %v386_v50 = vadd.f32 0.5, %v370_v41  ;;  %v347_v51 = vmul.f32 0.5, %v313_v42  ;;  %1034 = vmatprep.subr.bf16.mxu1 %v1033_v44 }
  0xf1   :  { %v1107_v52 = vpop.eup %1106  ;;  %v373_v53 = vmul.f32 0.5, %v1105_v48  ;;  %v346_v54 = vmul.f32 0.5, %v308_v47  ;;  %v938_v55 = vpop.f32.mrb[12].mxu0  ;;  %1036 = vmatpush3.bf16.msra.mxu1 %v1033_v44  ;;  %v403_v47 = vld [vmem:[%s1473_s3 + $0x18] sm:$0xff]  ;;  %v404_v48 = vld [vmem:[%s1473_s3 + $0x20] sm:$0xff] }
  0xf2   :  { %v372_v56 = vmul.f32 0.5, %v1107_v52  ;;  %1116 = vtanh.f32 %v347_v51  ;;  %v323_v57 = vadd.f32 %v938_v55, %v130_v45  ;;  %v317_v58 = vpop.f32.mrb[13].mxu0  ;;  %v1037_v59 = vpack.c.bf16 %v387_v46, %v386_v50  ;;  %v401_v45 = vld [vmem:[%s1473_s3 + $0x8] sm:$0xff]  ;;  %v402_v46 = vld [vmem:[%s1473_s3 + $0x10] sm:$0xff]  ;;  %v407_v51 = vld [vmem:[%s1473_s3 + $0x38] sm:$0xff] }
  0xf3   :  { %v389_v60 = vadd.f32 0.5, %v373_v53  ;;  %1118 = vtanh.f32 %v346_v54  ;;  %v318_v61 = vadd.f32 %v317_v58, %v125_v49  ;;  %v405_v49 = vld [vmem:[%s1473_s3 + $0x28] sm:$0xff]  ;;  %v406_v50 = vld [vmem:[%s1473_s3 + $0x30] sm:$0xff]  ;;  %v408_v52 = vld [vmem:[%s1473_s3 + $0x40] sm:$0xff] }
  0xf4   :  { %v1109_v62 = vpop.eup %1108  ;;  %v388_v63 = vadd.f32 0.5, %v372_v56  ;;  %v349_v0 = vmul.f32 0.5, %v323_v57  ;;  %1038 = vmatprep.subr.bf16.mxu1 %v1037_v59  ;;  %v409_v53 = vld [vmem:[%s1473_s3 + $0x48] sm:$0xff]  ;;  %v410_v54 = vld [vmem:[%s1473_s3 + $0x50] sm:$0xff]  ;;  %v411_v55 = vld [vmem:[%s1473_s3 + $0x58] sm:$0xff] }
  0xf5   :  { %v1111_v1 = vpop.eup %1110  ;;  %v375_v3 = vmul.f32 0.5, %v1109_v62  ;;  %v348_v4 = vmul.f32 0.5, %v318_v61  ;;  %v941_v5 = vpop.f32.mrb[14].mxu0  ;;  %1040 = vmatpush3.bf16.msra.mxu1 %v1037_v59  ;;  %v412_v56 = vld [vmem:[%s1473_s3 + $0x60] sm:$0xff]  ;;  %v413_v57 = vld [vmem:[%s1473_s3 + $0x68] sm:$0xff]  ;;  %v414_v58 = vld [vmem:[%s1473_s3 + $0x70] sm:$0xff] }
  0xf6   :  { %v374_v7 = vmul.f32 0.5, %v1111_v1  ;;  %1120 = vtanh.f32 %v349_v0  ;;  %v333_v8 = vadd.f32 %v941_v5, %v140_v2  ;;  %v327_v9 = vpop.f32.mrb[15].mxu0  ;;  %v1041_v10 = vpack.c.bf16 %v389_v60, %v388_v63  ;;  %v415_v59 = vld [vmem:[%s1473_s3 + $0x78] sm:$0xff]  ;;  %v440_v62 = vpop.permute.xlu1 %439 }
  0xf7   :  { %v391_v11 = vadd.f32 0.5, %v375_v3  ;;  %1122 = vtanh.f32 %v348_v4  ;;  %v328_v12 = vadd.f32 %v327_v9, %v135_v6  ;;  %v1189_v60 = vmov 0.0|0.0   ;;  %v435_v63 = vpop.permute.xlu0 %434 }
  0xf8   :  { %v1113_v13 = vpop.eup %1112  ;;  %v390_v14 = vadd.f32 0.5, %v374_v7  ;;  %v351_v15 = vmul.f32 0.5, %v333_v8  ;;  %1042 = vmatprep.subr.bf16.mxu1 %v1041_v10  ;;  %1065 = vmatprep.subr.bf16.mxu0 %v1189_v60  ;;  %v1191_v61 = vmov 0.0  }
  0xf9   :  { %v1115_v16 = vpop.eup %1114  ;;  %v377_v17 = vmul.f32 0.5, %v1113_v13  ;;  %v350_v18 = vmul.f32 0.5, %v328_v12  ;;  %1044 = vmatpush3.bf16.msra.mxu1 %v1041_v10  ;;  %1030 = vmatprep.mubr.msk.f32.mxu0 %vm1190_vm1, %v1191_v61 }
  0xfa   :  { %v376_v19 = vmul.f32 0.5, %v1115_v16  ;;  %1124 = vtanh.f32 %v351_v15  ;;  %v1045_v20 = vpack.c.bf16 %v391_v11, %v390_v14  ;;  %v450_v0 = vpop.permute.xlu1 %449 }
  0xfb   :  { %v393_v21 = vadd.f32 0.5, %v377_v17  ;;  %1126 = vtanh.f32 %v350_v18  ;;  %v445_v1 = vpop.permute.xlu0 %444 }
  0xfc   :  { %v1117_v22 = vpop.eup %1116  ;;  %v392_v23 = vadd.f32 0.5, %v376_v19  ;;  %1046 = vmatprep.subr.bf16.mxu1 %v1045_v20 }
  0xfd   :  { %v1119_v24 = vpop.eup %1118  ;;  %v379_v25 = vmul.f32 0.5, %v1117_v22  ;;  %1048 = vmatpush3.bf16.msra.mxu1 %v1045_v20 }
  0xfe   :  { %v378_v26 = vmul.f32 0.5, %v1119_v24  ;;  %v1049_v27 = vpack.c.bf16 %v393_v21, %v392_v23  ;;  %v460_v2 = vpop.permute.xlu1 %459 }
  0xff   :  { %v395_v28 = vadd.f32 0.5, %v379_v25  ;;  %v455_v3 = vpop.permute.xlu0 %454 }
 0x100   :  { %v1121_v29 = vpop.eup %1120  ;;  %v394_v30 = vadd.f32 0.5, %v378_v26  ;;  %1050 = vmatprep.subr.bf16.mxu1 %v1049_v27 }
 0x101   :  { %v1123_v31 = vpop.eup %1122  ;;  %v381_v32 = vmul.f32 0.5, %v1121_v29  ;;  %1052 = vmatpush3.bf16.msra.mxu1 %v1049_v27 }
 0x102   :  { %v380_v33 = vmul.f32 0.5, %v1123_v31  ;;  %v1053_v34 = vpack.c.bf16 %v395_v28, %v394_v30  ;;  %v470_v9 = vpop.permute.xlu1 %469 }
 0x103   :  { %v397_v35 = vadd.f32 0.5, %v381_v32  ;;  %v465_v12 = vpop.permute.xlu0 %464 }
 0x104   :  { %v1125_v36 = vpop.eup %1124  ;;  %v396_v37 = vadd.f32 0.5, %v380_v33  ;;  %1054 = vmatprep.subr.bf16.mxu1 %v1053_v34 }
 0x105   :  { %v1127_v38 = vpop.eup %1126  ;;  %v383_v39 = vmul.f32 0.5, %v1125_v36  ;;  %1056 = vmatpush3.bf16.msra.mxu1 %v1053_v34 }
 0x106   :  { %v382_v40 = vmul.f32 0.5, %v1127_v38  ;;  %v1057_v41 = vpack.c.bf16 %v397_v35, %v396_v37  ;;  %v480_v21 = vpop.permute.xlu1 %479 }
 0x107   :  { %v399_v42 = vadd.f32 0.5, %v383_v39  ;;  %v475_v23 = vpop.permute.xlu0 %474 }
 0x108   :  { %v398_v43 = vadd.f32 0.5, %v382_v40  ;;  %1058 = vmatprep.subr.bf16.mxu1 %v1057_v41 }
 0x109   :  { %1060 = vmatpush3.bf16.msra.mxu1 %v1057_v41 }
 0x10a   :  { %v1061_v44 = vpack.c.bf16 %v399_v42, %v398_v43  ;;  %v490_v33 = vpop.permute.xlu1 %489 }
 0x10b   :  { %v485_v37 = vpop.permute.xlu0 %484 }
 0x10c   :  { %1062 = vmatprep.subr.bf16.mxu1 %v1061_v44 }
 0x10d   :  { %1064 = vmatpush3.bf16.msra.mxu1 %v1061_v44 }
 0x110   :  { %975 = vmatmul.mubr.f32.vlgmr.msra.gmra.mrb[0].mxu1 %v401_v45 }
 0x111   :  { %977 = vmatprep.mubr.f32.mxu1 %v402_v46 }
 0x114   :  { %978 = vmatmul.mubr.f32.gmra.mrb[2].mxu1 %v403_v47 }
 0x115   :  { %980 = vmatprep.mubr.f32.mxu1 %v404_v48 }
 0x118   :  { %981 = vmatmul.mubr.f32.gmra.mrb[4].mxu1 %v405_v49 }
 0x119   :  { %983 = vmatprep.mubr.f32.mxu1 %v406_v50 }
 0x11c   :  { %984 = vmatmul.mubr.f32.gmra.mrb[6].mxu1 %v407_v51 }
 0x11d   :  { %986 = vmatprep.mubr.f32.mxu1 %v408_v52 }
 0x120   :  { %987 = vmatmul.mubr.f32.gmra.mrb[8].mxu1 %v409_v53 }
 0x121   :  { %989 = vmatprep.mubr.f32.mxu1 %v410_v54  ;;  %v500_v54 = vpop.permute.xlu1 %499 }
 0x124   :  { %990 = vmatmul.mubr.f32.gmra.mrb[10].mxu1 %v411_v55 }
 0x125   :  { %992 = vmatprep.mubr.f32.mxu1 %v412_v56 }
 0x128   :  { %993 = vmatmul.mubr.f32.gmra.mrb[12].mxu1 %v413_v57 }
 0x129   :  { %995 = vmatprep.mubr.f32.mxu1 %v414_v58  ;;  %v495_v58 = vpop.permute.xlu0 %494 }
 0x12c   :  { %996 = vmatmul.mubr.f32.gmra.mrb[14].mxu1 %v415_v59 }
 0x1e3   :  { %v976_v4 = vpop.f32.mrb[0].mxu1 }
 0x1e4   :  { %v584_v5 = vadd.f32 %v976_v4, %v440_v62  ;;  %v578_v6 = vpop.f32.mrb[1].mxu1 }
 0x1e5   :  { %v579_v7 = vadd.f32 %v578_v6, %v435_v63 }
 0x1e6   :  { %v658_v8 = vmul.f32 0.5, %v584_v5 }
 0x1e7   :  { %v657_v10 = vmul.f32 0.5, %v579_v7  ;;  %v979_v11 = vpop.f32.mrb[2].mxu1 }
 0x1e8   :  { %1128 = vtanh.f32 %v658_v8  ;;  %v594_v13 = vadd.f32 %v979_v11, %v450_v0  ;;  %v588_v14 = vpop.f32.mrb[3].mxu1 }
 0x1e9   :  { %1130 = vtanh.f32 %v657_v10  ;;  %v589_v15 = vadd.f32 %v588_v14, %v445_v1 }
 0x1ea   :  { %v660_v16 = vmul.f32 0.5, %v594_v13 }
 0x1eb   :  { %v659_v17 = vmul.f32 0.5, %v589_v15  ;;  %v982_v18 = vpop.f32.mrb[4].mxu1 }
 0x1ec   :  { %1132 = vtanh.f32 %v660_v16  ;;  %v604_v19 = vadd.f32 %v982_v18, %v460_v2  ;;  %v598_v20 = vpop.f32.mrb[5].mxu1  ;;  %v505_v16 = vpop.permute.xlu0 %504 }
 0x1ed   :  { %1134 = vtanh.f32 %v659_v17  ;;  %v599_v22 = vadd.f32 %v598_v20, %v455_v3 }
 0x1ee   :  { %v662_v24 = vmul.f32 0.5, %v604_v19 }
 0x1ef   :  { %v661_v25 = vmul.f32 0.5, %v599_v22  ;;  %v985_v26 = vpop.f32.mrb[6].mxu1 }
 0x1f0   :  { %1136 = vtanh.f32 %v662_v24  ;;  %v614_v27 = vadd.f32 %v985_v26, %v470_v9  ;;  %v608_v28 = vpop.f32.mrb[7].mxu1 }
 0x1f1   :  { %1138 = vtanh.f32 %v661_v25  ;;  %v609_v29 = vadd.f32 %v608_v28, %v465_v12  ;;  %v510_v12 = vpop.permute.xlu1 %509 }
 0x1f2   :  { %v1129_v30 = vpop.eup %1128  ;;  %v664_v31 = vmul.f32 0.5, %v614_v27 }
 0x1f3   :  { %v1131_v32 = vpop.eup %1130  ;;  %v690_v34 = vmul.f32 0.5, %v1129_v30  ;;  %v663_v35 = vmul.f32 0.5, %v609_v29  ;;  %v988_v36 = vpop.f32.mrb[8].mxu1 }
 0x1f4   :  { %v689_v38 = vmul.f32 0.5, %v1131_v32  ;;  %1140 = vtanh.f32 %v664_v31  ;;  %v624_v39 = vadd.f32 %v988_v36, %v480_v21  ;;  %v618_v40 = vpop.f32.mrb[9].mxu1 }
 0x1f5   :  { %v706_v41 = vadd.f32 0.5, %v690_v34  ;;  %1142 = vtanh.f32 %v663_v35  ;;  %v619_v42 = vadd.f32 %v618_v40, %v475_v23 }
 0x1f6   :  { %v1133_v43 = vpop.eup %1132  ;;  %v705_v44 = vadd.f32 0.5, %v689_v38  ;;  %v666_v45 = vmul.f32 0.5, %v624_v39 }
 0x1f7   :  { %v1135_v46 = vpop.eup %1134  ;;  %v692_v47 = vmul.f32 0.5, %v1133_v43  ;;  %v665_v48 = vmul.f32 0.5, %v619_v42  ;;  %v991_v49 = vpop.f32.mrb[10].mxu1 }
 0x1f8   :  { %v1066_v50 = vpack.c.bf16 %v706_v41, %v705_v44  ;;  %v691_v51 = vmul.f32 0.5, %v1135_v46  ;;  %1144 = vtanh.f32 %v666_v45  ;;  %v634_v52 = vadd.f32 %v991_v49, %v490_v33  ;;  %v628_v53 = vpop.f32.mrb[11].mxu1 }
 0x1f9   :  { %v708_v55 = vadd.f32 0.5, %v692_v47  ;;  %1146 = vtanh.f32 %v665_v48  ;;  %v629_v56 = vadd.f32 %v628_v53, %v485_v37 }
 0x1fa   :  { %v1137_v57 = vpop.eup %1136  ;;  %v707_v59 = vadd.f32 0.5, %v691_v51  ;;  %v668_v61 = vmul.f32 0.5, %v634_v52  ;;  %1067 = vmatpush3.bf16.msra.mxu0 %v1066_v50 }
 0x1fb   :  { %v1139_v62 = vpop.eup %1138  ;;  %v694_v63 = vmul.f32 0.5, %v1137_v57  ;;  %v667_v0 = vmul.f32 0.5, %v629_v56  ;;  %v994_v1 = vpop.f32.mrb[12].mxu1  ;;  %1068 = vmatprep.subr.bf16.mxu0 %v1189_v60  ;;  %v728_v56 = vlaneseq }
 0x1fc   :  { %v1069_v2 = vpack.c.bf16 %v708_v55, %v707_v59  ;;  %v693_v3 = vmul.f32 0.5, %v1139_v62  ;;  %1148 = vtanh.f32 %v668_v61  ;;  %v644_v4 = vadd.f32 %v994_v1, %v500_v54  ;;  %v638_v5 = vpop.f32.mrb[13].mxu1  ;;  %v721_v55 = vld [vmem:[%s1475_s5] sm:$0x1]  ;;  %v726_v59 = vpop.permute.xlu0 %725  ;;  %s1192_s5 = smov [#allocation3]  }
 0x1fd   :  { %v710_v6 = vadd.f32 0.5, %v694_v63  ;;  %1150 = vtanh.f32 %v667_v0  ;;  %v639_v7 = vadd.f32 %v638_v5, %v495_v58  ;;  %v729_v57 = vshrl.u32 %v728_v56, 7  ;;  %s826_s24 = sshll.u32 %s1192_s5, 4  ;;  %s827_s24 = int_to_ptr.vmem [resolvable:$true] %s826_s24 }
 0x1fe   :  { %v1141_v8 = vpop.eup %1140  ;;  %v709_v9 = vadd.f32 0.5, %v693_v3  ;;  %v670_v10 = vmul.f32 0.5, %v644_v4  ;;  %1070 = vmatpush3.bf16.msra.mxu0 %v1069_v2  ;;  %s1164_s25 = scalar_lea.vmem %s827_s24, 32  ;;  %p1169_p1 = scmp.lt.s32.totalorder %s827_s24, %s827_s24 }
 0x1ff   :  { %v1143_v11 = vpop.eup %1142  ;;  %v696_v13 = vmul.f32 0.5, %v1141_v8  ;;  %v669_v14 = vmul.f32 0.5, %v639_v7  ;;  %v997_v15 = vpop.f32.mrb[14].mxu1  ;;  %1071 = vmatprep.subr.bf16.mxu0 %v1189_v60  ;;  %v730_v58 = vsub.s32 0, %v729_v57  ;;  %p1165_p0 = scmp.ne.s32.totalorder %s827_s24, %s1164_s25  ;;  %p1170_p2 = scmp.lt.s32.totalorder %s1164_s25, %s1164_s25 }
 0x200   :  { %v1072_v17 = vpack.c.bf16 %v710_v6, %v709_v9  ;;  %v695_v18 = vmul.f32 0.5, %v1143_v11  ;;  %1152 = vtanh.f32 %v670_v10  ;;  %v654_v19 = vadd.f32 %v997_v15, %v510_v12  ;;  %v648_v20 = vpop.f32.mrb[15].mxu1 }
 0x201   :  { %v712_v21 = vadd.f32 0.5, %v696_v13  ;;  %1154 = vtanh.f32 %v669_v14  ;;  %v649_v22 = vadd.f32 %v648_v20, %v505_v16  ;;  %v731_v61 = vrot.slane %v726_v59, %v730_v58  ;;  %p1171_p3 = por %p1170_p2, %p1169_p1 }
 0x202   :  { %v1145_v23 = vpop.eup %1144  ;;  %v711_v24 = vadd.f32 0.5, %v695_v18  ;;  %v672_v25 = vmul.f32 0.5, %v654_v19  ;;  %1073 = vmatpush3.bf16.msra.mxu0 %v1072_v17 }
 0x203   :  { %v1147_v26 = vpop.eup %1146  ;;  %v698_v27 = vmul.f32 0.5, %v1145_v23  ;;  %v671_v28 = vmul.f32 0.5, %v649_v22  ;;  %1074 = vmatprep.subr.bf16.mxu0 %v1189_v60  ;;  %p1172_p4 = pnand %p1171_p3, %p1165_p0 }
 0x204   :  { %v1075_v29 = vpack.c.bf16 %v712_v21, %v711_v24  ;;  %v697_v30 = vmul.f32 0.5, %v1147_v26  ;;  %1156 = vtanh.f32 %v672_v25 }
 0x205   :  { %v714_v31 = vadd.f32 0.5, %v698_v27  ;;  %1158 = vtanh.f32 %v671_v28 }
 0x206   :  { %v1149_v32 = vpop.eup %1148  ;;  %v713_v33 = vadd.f32 0.5, %v697_v30  ;;  %1076 = vmatpush3.bf16.msra.mxu0 %v1075_v29 }
 0x207   :  { %v1151_v34 = vpop.eup %1150  ;;  %v700_v35 = vmul.f32 0.5, %v1149_v32  ;;  %1077 = vmatprep.subr.bf16.mxu0 %v1189_v60 }
 0x208   :  { %v1078_v36 = vpack.c.bf16 %v714_v31, %v713_v33  ;;  %v699_v37 = vmul.f32 0.5, %v1151_v34 }
 0x209   :  { %v716_v38 = vadd.f32 0.5, %v700_v35 }
 0x20a   :  { %v1153_v39 = vpop.eup %1152  ;;  %v715_v40 = vadd.f32 0.5, %v699_v37  ;;  %1079 = vmatpush3.bf16.msra.mxu0 %v1078_v36 }
 0x20b   :  { %v1155_v41 = vpop.eup %1154  ;;  %v702_v42 = vmul.f32 0.5, %v1153_v39  ;;  %1080 = vmatprep.subr.bf16.mxu0 %v1189_v60 }
 0x20c   :  { %v1081_v43 = vpack.c.bf16 %v716_v38, %v715_v40  ;;  %v701_v44 = vmul.f32 0.5, %v1155_v41 }
 0x20d   :  { %v718_v45 = vadd.f32 0.5, %v702_v42 }
 0x20e   :  { %v1157_v46 = vpop.eup %1156  ;;  %v717_v47 = vadd.f32 0.5, %v701_v44  ;;  %1082 = vmatpush3.bf16.msra.mxu0 %v1081_v43 }
 0x20f   :  { %v1159_v48 = vpop.eup %1158  ;;  %v704_v49 = vmul.f32 0.5, %v1157_v46  ;;  %1083 = vmatprep.subr.bf16.mxu0 %v1189_v60 }
 0x210   :  { %v1084_v50 = vpack.c.bf16 %v718_v45, %v717_v47  ;;  %v703_v51 = vmul.f32 0.5, %v1159_v48 }
 0x211   :  { %v720_v52 = vadd.f32 0.5, %v704_v49 }
 0x212   :  { %v719_v53 = vadd.f32 0.5, %v703_v51  ;;  %1085 = vmatpush3.bf16.msra.mxu0 %v1084_v50 }
 0x213   :  { %1086 = vmatprep.subr.bf16.mxu0 %v1189_v60 }
 0x214   :  { %v1087_v54 = vpack.c.bf16 %v720_v52, %v719_v53 }
 0x216   :  { %1088 = vmatpush3.bf16.msra.mxu0 %v1087_v54 }
 0x219   :  { %1031 = vmatmul.mubr.f32.vlgmr.msra.gmra.mrb[16].mxu0 %v721_v55 }
 0x2ec   :  { %v798_v62 = vpop.f32.mrb[16].mxu0 }
 0x2ed   :  { %v799_v63 = vadd.f32 %v798_v62, %v731_v61  ;;  %v1032_v0 = vpop.f32.mrb[17].mxu0 }
 0x2ef   :  { %v803_v1 = vand.u32 2147483647, %v799_v63  ;;  %v802_v6 = vmax.f32 %v799_v63, 0.0 }
 0x2f1   :  { %v804_v2 = vsub.f32 0.0, %v803_v1 }
 0x2f3   :  { %v805_v3 = vmul.f32 1.442695, %v804_v2 }
 0x2f5   :  { %1160 = vpow2.f32 %v805_v3 }
 0x2ff   :  { %v1161_v60 = vpop.eup %1160 }
 0x300   :  { %v807_v4 = vadd.f32 1.0, %v1161_v60 }
 0x302   :  { %1162 = vlog2.f32 %v807_v4 }
 0x30c   :  { %v1163_v5 = vpop.eup %1162 }
 0x30d   :  { %v809_v7 = vmul.f32 0.6931472, %v1163_v5 }
 0x30f   :  { %v810_v8 = vadd.f32 %v809_v7, %v802_v6 }
 0x311   :  { %v812_v9 = vsub.f32 %v799_v63, %v810_v8  ;;  %v811_v11 = vsub.f32 0.0, %v810_v8 }
 0x313   :  { %v814_v10 = vrot.slane %v812_v9, 7 }
 0x315   :  { %v817_v12 = vsel %vm816_vm2, %v811_v11, %v814_v10 }
 0x316   :  { %819 = vst.msk [vmem:[#allocation3] sm:$0x3] %vm818_vm3, %v817_v12 }
 0x317   :  { %1175 = shalt.err (!%p1172_p4)
}
 0x318   :  { %s1176_s28 = scalar_lea.hbm %s1477_s7, 32 }
 0x319   :  { %p1177_p5 = scmp.ne.s32.totalorder %s1477_s7, %s1176_s28  ;;  %p1180_p6 = scmp.lt.u32.totalorder %s1176_s28, %s1477_s7 }
 0x31b   :  { %p1182_p7 = pnand %p1180_p6, %p1177_p5 }
 0x31d   :  { %1185 = shalt.err (!%p1182_p7)
}
 0x31e   :  { %829 = dma.vmem_to_hbm [thread:$0]  %s827_s24, 32, %s1477_s7, [#allocation4]  }
 0x31f   :  { %1186 = dma.done.wait [#allocation4], 32  }
 0x320   :  { %1187 = vsyncadd [#allocation4], 4294967264 }
 0x321   :  { %833 = vsyncpa [#allocation4], 1 }

</bundles_post_ra>
